<compile_context>
chip_gen: v6e
topology: v6e:2x2x1
jax: 0.10.0
libtpu: 0.0.40
codegen_flags: <defaults>
</compile_context>

<pallas_src>
import functools

import jax
import jax.numpy as jnp
from jax import lax
from jax.experimental import pallas as pl
from jax.experimental.pallas import tpu as pltpu

_LANE = 128


def _round_up(x, m):
    return ((x + m - 1) // m) * m


def _pick_row_tile(hw_pad, f, c2):
    # Largest lane-dense tile dividing hw_pad while keeping the biggest f32
    # intermediate (TR x max(F, 2C)) within ~128 KiB (~32 vregs) to avoid spills.
    cap = max(_LANE, (128 * 1024) // (4 * max(f, c2)))
    for cand in (2048, 1024, 512, 256, 128):
        if cand <= cap and hw_pad % cand == 0:
            return cand
    return _LANE


# ----------------------------------------------------------------------------
# Kernel 1: fused feedforward (1x1 conv + GELU) + recurrent step + decorr Gram
# ----------------------------------------------------------------------------
def core_forward_kernel(persp_ref, bias_ref, wf_ref, bf_ref, wzn_ref,
                        out_ref, gram_ref, *, hw_valid, needs_mask):
    nb = pl.program_id(2)
    ti = pl.program_id(3)

    # Gram accumulator is VMEM-resident across the (nb, t) reduction axes.
    @pl.when(jnp.logical_and(nb == 0, ti == 0))
    def _init():
        gram_ref[0, 0] = jnp.zeros_like(gram_ref[0, 0])

    C = out_ref.shape[2]
    TR = out_ref.shape[3]

    # channels-first tile [P, TR]; f32 in HBM, cast to bf16 on the VPU here so
    # the wrapper never runs a separate full-tensor cast/transposition pass.
    x = persp_ref[0, 0].astype(jnp.bfloat16)

    # feedforward 1x1 conv: [F,P] @ [P,TR] on the MXU (lane dim = TR), + approx GELU
    f = jnp.dot(wf_ref[0], x, preferred_element_type=jnp.float32) + bf_ref[0]
    f = jax.nn.gelu(f, approximate=True)                           # [F, TR] f32

    # fused recurrent projections: [2C,F] @ [F,TR]; modulation contribution and
    # the bz/bn biases are pre-folded into the per-(s, n) bias column.
    zn = (jnp.dot(wzn_ref[0], f.astype(jnp.bfloat16),
                  preferred_element_type=jnp.float32)
          + bias_ref[0, 0])                                        # [2C, TR] f32
    z_pre = zn[:C]
    n_pre = zn[C:]
    # (1 - sigmoid(z)) == sigmoid(-z): saves a VPU subtract.
    r = jax.nn.sigmoid(-z_pre) * jnp.tanh(n_pre)                   # [C, TR] f32

    # already in output (NCHW) orientation: lane-dense store, no in-kernel transpose
    out_ref[0, 0] = r.astype(out_ref.dtype)

    # decorr Gram accumulation (sum over spatial/batch), bf16 operands, f32 accum.
    if needs_mask:
        col = ti * TR + lax.broadcasted_iota(jnp.int32, r.shape, 1)
        r = jnp.where(col < hw_valid, r, 0.0)
    r_b = r.astype(jnp.bfloat16)
    gram_ref[0, 0] += lax.dot_general(
        r_b, r_b, (((1,), (1,)), ((), ())),
        preferred_element_type=jnp.float32)


def core_forward(persp, zn_bias, wf_t, bf_col, wzn_t, hw_valid, *,
                 out_dtype=jnp.bfloat16):
    """persp:   [N, S, P, HW_pad] f32  (channels-first rows, lane dim = spatial)
       zn_bias: [S, N, 2C, 1]     f32  (mod @ [wzm|wnm] + [bz|bn], column vector)
       wf_t:    [S, F, P]         bf16
       bf_col:  [S, F, 1]         f32
       wzn_t:   [S, 2C, F]        bf16
       -> (out [N, S, C, HW_pad] out_dtype, gram [S, G, C, C] f32)."""
    N, S, P, HWp = persp.shape
    F = wf_t.shape[1]
    C2 = wzn_t.shape[1]
    C = C2 // 2
    TR = _pick_row_tile(HWp, F, C2)
    T = HWp // TR

    # Batch-shard axis: a 'parallel' axis that feeds v7x's 2 TensorCores even
    # when S == 1 (stream given); harmless on single-TC v5e/v6e.
    G = 2 if (N % 2 == 0 and N >= 2) else 1
    NB = N // G

    kernel = functools.partial(core_forward_kernel,
                               hw_valid=hw_valid,
                               needs_mask=(hw_valid != HWp))

    return pl.pallas_call(
        kernel,
        out_shape=(jax.ShapeDtypeStruct((N, S, C, HWp), out_dtype),
                   jax.ShapeDtypeStruct((S, G, C, C), jnp.float32)),
        grid_spec=pltpu.PrefetchScalarGridSpec(
            num_scalar_prefetch=0,
            grid=(S, G, NB, T),
            in_specs=[
                pl.BlockSpec((1, 1, P, TR),                        # perspective
                             lambda s, g, nb, t: (g * NB + nb, s, 0, t)),
                pl.BlockSpec((1, 1, C2, 1),                        # mod bias column
                             lambda s, g, nb, t: (s, g * NB + nb, 0, 0)),
                pl.BlockSpec((1, F, P),  lambda s, g, nb, t: (s, 0, 0)),   # wf^T
                pl.BlockSpec((1, F, 1),  lambda s, g, nb, t: (s, 0, 0)),   # bf
                pl.BlockSpec((1, C2, F), lambda s, g, nb, t: (s, 0, 0)),   # [wzf|wnf]^T
            ],
            out_specs=[
                pl.BlockSpec((1, 1, C, TR),                        # NCHW output
                             lambda s, g, nb, t: (g * NB + nb, s, 0, t)),
                pl.BlockSpec((1, 1, C, C),                         # Gram partials
                             lambda s, g, nb, t: (s, g, 0, 0)),
            ],
        ),
        compiler_params=pltpu.CompilerParams(
            # (s, g) are parallel (megacore / v7x 2-TC sharding); (nb, t) are the
            # Gram-reduction axes and must stay arbitrary.
            dimension_semantics=("parallel", "parallel", "arbitrary", "arbitrary"),
            # tiles are tiny here; explicit cap keeps 2-deep pipelining safely
            # under v7x's 64 MiB physical VMEM per TensorCore.
            vmem_limit_bytes=32 * 1024 * 1024,
        ),
    )(persp, zn_bias, wf_t, bf_col, wzn_t)


# ----------------------------------------------------------------------------
# Kernel 2: decorrelation finalize (normalize [C, C] Gram means, upper triangle)
# ----------------------------------------------------------------------------
def decorr_finalize_kernel(gram_ref, out_ref, *, eps, inv_t):
    g = gram_ref[0] * inv_t                                 # [C, C] = mean(p_i p_j)
    C = g.shape[0]
    row = lax.broadcasted_iota(jnp.int32, (C, C), 0)
    col = lax.broadcasted_iota(jnp.int32, (C, C), 1)
    eye = (row == col).astype(jnp.float32)
    v_row = jnp.sum(g * eye, axis=1, keepdims=True)         # [C, 1] = mean(p^2)
    v_col = jnp.sum(g * eye, axis=0, keepdims=True)         # [1, C]
    c = g / jnp.sqrt(v_row * v_col + eps)
    mask = (col > row).astype(jnp.float32)                  # strict upper triangle
    partial = jnp.sum(jnp.abs(c) * mask, axis=1, keepdims=True)   # [C, 1]
    out_ref[0] = jnp.sum(partial, axis=0, keepdims=True)          # [1, 1]


def decorr_finalize(gram, total_count, eps):
    """gram: [S, C, C] f32 Gram sums, total_count: python int -> [S, 1, 1] f32."""
    S, C, _ = gram.shape
    return pl.pallas_call(
        functools.partial(decorr_finalize_kernel,
                          eps=float(eps), inv_t=1.0 / float(total_count)),
        out_shape=jax.ShapeDtypeStruct((S, 1, 1), jnp.float32),
        grid_spec=pltpu.PrefetchScalarGridSpec(
            num_scalar_prefetch=0,
            grid=(S,),
            in_specs=[pl.BlockSpec((1, C, C), lambda s: (s, 0, 0))],
            out_specs=pl.BlockSpec((1, 1, 1), lambda s: (s, 0, 0)),
        ),
        compiler_params=pltpu.CompilerParams(
            dimension_semantics=("parallel",)),
    )(gram)


# ----------------------------------------------------------------------------
# Module wrapper (parameter init, layout plumbing, host-side `past`)
# ----------------------------------------------------------------------------
class FeedforwardRecurrentDecorrPallas:
    def __init__(self, perspectives, modulations, streams,
                 ff_channels, channels,
                 decorr_length=1, decorr_weight=1.0, decorr_rate=0.0,
                 decorr_eps=1e-5, out_dtype=jnp.bfloat16, key=None):
        assert decorr_length >= 0 and decorr_weight >= 0
        assert 0 <= decorr_rate < 1 and decorr_eps >= 0
        # TODO(synk): decorr_rate > 0 (random column subsampling of the activation
        # matrix) has no Gram-sum equivalent and is not implemented.
        assert decorr_rate == 0.0, "decorr_rate > 0 is not supported"
        self.P, self.M, self.S = int(perspectives), int(modulations), int(streams)
        self.F, self.C = int(ff_channels), int(channels)
        self.decorr_length = int(decorr_length)
        self.decorr_weight = float(decorr_weight)
        self.decorr_rate = float(decorr_rate)
        self.decorr_eps = float(decorr_eps)
        self.out_dtype = out_dtype
        self.past = []          # list of (gram_sum [S,C,C], sample_count) per call
        self.training = True

        key = jax.random.PRNGKey(0) if key is None else key
        ks = jax.random.split(key, 8)
        S, P, M, F, C = self.S, self.P, self.M, self.F, self.C
        nrm = lambda k, shape, fan: (jax.random.normal(k, shape, jnp.float32)
                                     / jnp.sqrt(jnp.float32(fan)))
        self.params = {
            "wf":  nrm(ks[0], (S, P, F), P),
            "bf":  0.01 * jax.random.normal(ks[1], (S, 1, F), jnp.float32),
            "wzf": nrm(ks[2], (S, F, C), F + M),
            "wzm": nrm(ks[3], (S, M, C), F + M),
            "bz":  0.01 * jax.random.normal(ks[4], (S, 1, C), jnp.float32),
            "wnf": nrm(ks[5], (S, F, C), F + M),
            "wnm": nrm(ks[6], (S, M, C), F + M),
            "bn":  0.01 * jax.random.normal(ks[7], (S, 1, C), jnp.float32),
        }
        self._prepare_weights()

    def _prepare_weights(self):
        """Hoisted per-call weight prep: concat / transpose / bf16 cast done once.
        Call again if self.params is updated."""
        p = self.params
        self._wf_t = jnp.transpose(p["wf"], (0, 2, 1)).astype(jnp.bfloat16)   # [S,F,P]
        self._bf_col = jnp.transpose(p["bf"], (0, 2, 1))                      # [S,F,1]
        wzn = jnp.concatenate([p["wzf"], p["wnf"]], axis=-1)                  # [S,F,2C]
        self._wzn_t = jnp.transpose(wzn, (0, 2, 1)).astype(jnp.bfloat16)      # [S,2C,F]
        self._wm = jnp.concatenate([p["wzm"], p["wnm"]], axis=-1)             # [S,M,2C]
        self._bzn = jnp.concatenate([p["bz"], p["bn"]], axis=-1)              # [S,1,2C]

    @property
    def channels(self):
        return self.C

    def _reset(self):
        self.past.clear()

    def forward(self, perspective, modulation, stream=None):
        """perspective: [N, S*P, H, W] (or [N, P, H, W]); modulation: [N, S*M] (or [N, M])."""
        P, M, C = self.P, self.M, self.C
        if stream is None:
            S = self.S
            wf_t, bf_col, wzn_t, wm, bzn = (self._wf_t, self._bf_col,
                                            self._wzn_t, self._wm, self._bzn)
        else:
            S = 1
            sl = slice(stream, stream + 1)
            wf_t, bf_col, wzn_t, wm, bzn = (self._wf_t[sl], self._bf_col[sl],
                                            self._wzn_t[sl], self._wm[sl],
                                            self._bzn[sl])

        N, SP, H, W = perspective.shape
        assert SP == S * P and modulation.shape == (N, S * M)
        HW = H * W
        HWp = _round_up(HW, _LANE)

        # NCHW -> channels-first rows [N, S, P, HW]: a free contiguous reshape;
        # no HBM transpose / cast pass over the big input (cast happens in-kernel).
        persp = perspective.reshape(N, S, P, HW)
        if HWp != HW:
            persp = jnp.pad(persp, ((0, 0), (0, 0), (0, 0), (0, HWp - HW)))

        # Hoisted modulation projection (M-dim == 1 matmuls are wasted on the MXU):
        # zn_bias[s, n] = mod[s, n] @ [wzm|wnm][s] + [bz|bn][s]  -> [S, N, 2C, 1]
        mod = jnp.transpose(modulation.reshape(N, S, M), (1, 0, 2)).astype(jnp.float32)
        zn_bias = (jnp.einsum("snm,smc->snc", mod, wm) + bzn)[..., None]

        out, gram = core_forward(persp, zn_bias, wf_t, bf_col, wzn_t, HW,
                                 out_dtype=self.out_dtype)

        # [N, S, C, HWp] -> NCHW [N, S*C, H, W]: free reshape when HW % 128 == 0
        # (kernel already stored NCHW order), otherwise a slice of the padding.
        if HWp != HW:
            out = out[..., :HW]
        x = out.reshape(N, S * C, H, W)

        if self.training and self.decorr_length > 0:
            # Gram sums are additive across timesteps, so storing [S, C, C] + count
            # is exactly equivalent to the original concatenate-then-mean (rate=0).
            gram_s = jnp.sum(gram, axis=1)        # sum batch-shard partials -> [S,C,C]
            self.past.append((gram_s, N * H * W))
            if len(self.past) > self.decorr_length:
                self.past.pop(0)
        return x

    def regularize(self):
        if not self.past:
            return jnp.float32(0.0)
        gram_total = self.past[0][0]
        for g, _ in self.past[1:]:
            gram_total = gram_total + g
        t_total = sum(t for _, t in self.past)
        per_stream = decorr_finalize(gram_total, t_total, self.decorr_eps)  # [S,1,1]
        return jnp.sum(per_stream) * self.decorr_weight


# ----------------------------------------------------------------------------
# Pure-JAX reference (for correctness check)
# ----------------------------------------------------------------------------
def reference_forward(perspective, modulation, params, S, P, M):
    N, SP, H, W = perspective.shape
    persp = perspective.reshape(N, S, P, H, W).astype(jnp.float32)
    persp = jnp.transpose(persp, (1, 0, 3, 4, 2)).reshape(S, N, H * W, P)
    mod = jnp.transpose(modulation.reshape(N, S, M), (1, 0, 2)).astype(jnp.float32)

    f = jax.nn.gelu(jnp.einsum("snxp,spf->snxf", persp, params["wf"])
                    + params["bf"][:, None], approximate=True)
    zm = jnp.einsum("snm,smc->snc", mod, params["wzm"])[:, :, None]
    nm = jnp.einsum("snm,smc->snc", mod, params["wnm"])[:, :, None]
    z = jax.nn.sigmoid(jnp.einsum("snxf,sfc->snxc", f, params["wzf"])
                       + zm + params["bz"][:, None])
    n = jnp.tanh(jnp.einsum("snxf,sfc->snxc", f, params["wnf"])
                 + nm + params["bn"][:, None])
    r = (1.0 - z) * n                                                # [S, N, HW, C]
    C = r.shape[-1]
    x = jnp.transpose(r.reshape(S, N, H, W, C), (1, 0, 4, 2, 3)).reshape(N, S * C, H, W)
    p = jnp.transpose(r, (0, 3, 1, 2)).reshape(S, C, N * H * W)
    return x, p


def reference_penalty(p, eps, weight):
    S, C, T = p.shape
    i, j = jnp.triu_indices(C, k=1)
    c = jnp.mean(p[:, i] * p[:, j], axis=2)
    v = jnp.mean(p ** 2, axis=2)
    c = c / jnp.sqrt(v[:, i] * v[:, j] + eps)
    return jnp.sum(jnp.abs(c)) * weight


# ----------------------------------------------------------------------------
if __name__ == "__main__":
    N, S, P, M, H, W = 2, 2, 4, 8, 16, 16
    F, C = 16, 16

    key = jax.random.PRNGKey(0)
    k_persp, k_mod, k_param = jax.random.split(key, 3)
    perspective = jax.random.normal(k_persp, (N, S * P, H, W), jnp.float32)
    modulation = jax.random.normal(k_mod, (N, S * M), jnp.float32)

    core = FeedforwardRecurrentDecorrPallas(
        perspectives=P, modulations=M, streams=S,
        ff_channels=F, channels=C,
        decorr_length=1, decorr_weight=1.0, decorr_rate=0.0,
        decorr_eps=1e-5, key=k_param)

    x = core.forward(perspective, modulation, stream=None)   # [N, S*C, H, W]
    penalty = core.regularize()
    jax.block_until_ready(x)
    jax.block_until_ready(penalty)

    # correctness check against plain-JAX f32 reference (bf16 MXU operands and
    # bf16 output store in the kernel -> loosened tolerances)
    x_ref, p_ref = reference_forward(perspective, modulation, core.params, S, P, M)
    pen_ref = reference_penalty(p_ref, core.decorr_eps, core.decorr_weight)
    assert x.shape == (N, S * C, H, W)
    assert jnp.allclose(x.astype(jnp.float32), x_ref, atol=3e-2, rtol=3e-2), \
        "forward mismatch"
    assert jnp.allclose(penalty, pen_ref, atol=2e-2, rtol=5e-2), "penalty mismatch"

    print("KERNEL_OK")
</pallas_src>

<mosaic_0001>
module attributes {stable_mosaic.version = 11 : i64} {
  func.func @core_forward_kernel(%arg0: i32, %arg1: i32, %arg2: i32, %arg3: i32, %arg4: memref<1x1x4x256xf32, #tpu.memory_space<vmem>>, %arg5: memref<1x1x32x1xf32, #tpu.memory_space<vmem>>, %arg6: memref<1x16x4xbf16, #tpu.memory_space<vmem>>, %arg7: memref<1x16x1xf32, #tpu.memory_space<vmem>>, %arg8: memref<1x32x16xbf16, #tpu.memory_space<vmem>>, %arg9: memref<1x1x16x256xbf16, #tpu.memory_space<vmem>>, %arg10: memref<1x1x16x16xf32, #tpu.memory_space<vmem>>) attributes {dimension_semantics = [#tpu.dimension_semantics<parallel>, #tpu.dimension_semantics<parallel>, #tpu.dimension_semantics<arbitrary>, #tpu.dimension_semantics<arbitrary>], iteration_bounds = array<i64: 2, 2, 1, 1>, scalar_prefetch = 0 : i64, scratch_operands = 0 : i64, tpu.core_type = #tpu.core_type<tc>, window_params = [{transform_indices = @transform_0, window_bounds = array<i64: 1, 1, 4, 256>}, {transform_indices = @transform_1, window_bounds = array<i64: 1, 1, 32, 1>}, {transform_indices = @transform_2, window_bounds = array<i64: 1, 16, 4>}, {transform_indices = @transform_3, window_bounds = array<i64: 1, 16, 1>}, {transform_indices = @transform_4, window_bounds = array<i64: 1, 32, 16>}, {transform_indices = @transform_5, window_bounds = array<i64: 1, 1, 16, 256>}, {transform_indices = @transform_6, window_bounds = array<i64: 1, 1, 16, 16>}]} {
    %c0_i32 = arith.constant 0 : i32
    %0 = arith.cmpi eq, %arg2, %c0_i32 : i32
    %c0_i32_0 = arith.constant 0 : i32
    %1 = arith.cmpi eq, %arg3, %c0_i32_0 : i32
    %2 = arith.andi %0, %1 : i1
    %3 = arith.extui %2 : i1 to i32
    %c0_i32_1 = arith.constant 0 : i32
    %4 = arith.cmpi ne, %3, %c0_i32_1 : i32
    scf.if %4 {
      %cst_38 = arith.constant 0.000000e+00 : f32
      %59 = vector.broadcast %cst_38 : f32 to vector<16x16xf32>
      %c0_39 = arith.constant 0 : index
      %c0_40 = arith.constant 0 : index
      %c0_41 = arith.constant 0 : index
      %c0_42 = arith.constant 0 : index
      %60 = vector.load %arg10[%c0_39, %c0_40, %c0_41, %c0_42] : memref<1x1x16x16xf32, #tpu.memory_space<vmem>>, vector<1x1x16x16xf32>
      %61 = vector.shape_cast %60 : vector<1x1x16x16xf32> to vector<16x16xf32>
      %62 = vector.shape_cast %59 : vector<16x16xf32> to vector<1x1x16x16xf32>
      tpu.vector_store %arg10[%c0_39, %c0_40, %c0_41, %c0_42], %62 {strides = array<i32>} : memref<1x1x16x16xf32, #tpu.memory_space<vmem>>, vector<1x1x16x16xf32>,
    } else {
    }
    %c0 = arith.constant 0 : index
    %c0_2 = arith.constant 0 : index
    %c0_3 = arith.constant 0 : index
    %c0_4 = arith.constant 0 : index
    %5 = vector.load %arg4[%c0, %c0_2, %c0_3, %c0_4] : memref<1x1x4x256xf32, #tpu.memory_space<vmem>>, vector<1x1x4x256xf32>
    %6 = vector.shape_cast %5 : vector<1x1x4x256xf32> to vector<4x256xf32>
    %7 = arith.truncf %6 : vector<4x256xf32> to vector<4x256xbf16>
    %c0_5 = arith.constant 0 : index
    %c0_6 = arith.constant 0 : index
    %c0_7 = arith.constant 0 : index
    %8 = vector.load %arg6[%c0_5, %c0_6, %c0_7] : memref<1x16x4xbf16, #tpu.memory_space<vmem>>, vector<1x16x4xbf16>
    %9 = vector.shape_cast %8 : vector<1x16x4xbf16> to vector<16x4xbf16>
    %cst = arith.constant dense<0.000000e+00> : vector<16x256xf32>
    %10 = tpu.matmul %9, %7, %cst {dimension_numbers = #tpu.dot_dimension_numbers<[1], [0], [0], [1], [0, 0, 1, 1], [], []>} : vector<16x4xbf16>, vector<4x256xbf16>, vector<16x256xf32> -> vector<16x256xf32>
    %c0_8 = arith.constant 0 : index
    %c0_9 = arith.constant 0 : index
    %c0_10 = arith.constant 0 : index
    %11 = vector.load %arg7[%c0_8, %c0_9, %c0_10] : memref<1x16x1xf32, #tpu.memory_space<vmem>>, vector<1x16x1xf32>
    %12 = vector.shape_cast %11 : vector<1x16x1xf32> to vector<16x1xf32>
    %13 = vector.broadcast %12 : vector<16x1xf32> to vector<16x256xf32>
    %14 = arith.addf %10, %13 : vector<16x256xf32>
    %15 = arith.mulf %14, %14 : vector<16x256xf32>
    %16 = arith.mulf %14, %15 : vector<16x256xf32>
    %cst_11 = arith.constant 4.471500e-02 : f32
    %17 = vector.broadcast %cst_11 : f32 to vector<16x256xf32>
    %18 = arith.mulf %17, %16 : vector<16x256xf32>
    %19 = arith.addf %14, %18 : vector<16x256xf32>
    %cst_12 = arith.constant 0.797884583 : f32
    %20 = vector.broadcast %cst_12 : f32 to vector<16x256xf32>
    %21 = arith.mulf %20, %19 : vector<16x256xf32>
    %22 = math.tanh %21 : vector<16x256xf32>
    %cst_13 = arith.constant 1.000000e+00 : f32
    %23 = vector.broadcast %cst_13 : f32 to vector<16x256xf32>
    %24 = arith.addf %23, %22 : vector<16x256xf32>
    %cst_14 = arith.constant 5.000000e-01 : f32
    %25 = vector.broadcast %cst_14 : f32 to vector<16x256xf32>
    %26 = arith.mulf %25, %24 : vector<16x256xf32>
    %27 = arith.mulf %14, %26 : vector<16x256xf32>
    %c0_15 = arith.constant 0 : index
    %c0_16 = arith.constant 0 : index
    %c0_17 = arith.constant 0 : index
    %28 = vector.load %arg8[%c0_15, %c0_16, %c0_17] : memref<1x32x16xbf16, #tpu.memory_space<vmem>>, vector<1x32x16xbf16>
    %29 = vector.shape_cast %28 : vector<1x32x16xbf16> to vector<32x16xbf16>
    %30 = arith.truncf %27 : vector<16x256xf32> to vector<16x256xbf16>
    %cst_18 = arith.constant dense<0.000000e+00> : vector<32x256xf32>
    %31 = tpu.matmul %29, %30, %cst_18 {dimension_numbers = #tpu.dot_dimension_numbers<[1], [0], [0], [1], [0, 0, 1, 1], [], []>} : vector<32x16xbf16>, vector<16x256xbf16>, vector<32x256xf32> -> vector<32x256xf32>
    %c0_19 = arith.constant 0 : index
    %c0_20 = arith.constant 0 : index
    %c0_21 = arith.constant 0 : index
    %c0_22 = arith.constant 0 : index
    %32 = vector.load %arg5[%c0_19, %c0_20, %c0_21, %c0_22] : memref<1x1x32x1xf32, #tpu.memory_space<vmem>>, vector<1x1x32x1xf32>
    %33 = vector.shape_cast %32 : vector<1x1x32x1xf32> to vector<32x1xf32>
    %34 = vector.broadcast %33 : vector<32x1xf32> to vector<32x256xf32>
    %35 = arith.addf %31, %34 : vector<32x256xf32>
    %36 = vector.extract_strided_slice %35 {offsets = [0, 0], sizes = [16, 256], strides = [1, 1]} : vector<32x256xf32> to vector<16x256xf32>
    %37 = vector.extract_strided_slice %35 {offsets = [16, 0], sizes = [16, 256], strides = [1, 1]} : vector<32x256xf32> to vector<16x256xf32>
    %cst_23 = arith.constant 0.000000e+00 : f32
    %38 = vector.broadcast %cst_23 : f32 to vector<16x256xf32>
    %39 = arith.subf %38, %36 : vector<16x256xf32>
    %40 = arith.negf %39 : vector<16x256xf32>
    %41 = math.exp %40 : vector<16x256xf32>
    %cst_24 = arith.constant 1.000000e+00 : f32
    %42 = vector.broadcast %cst_24 : f32 to vector<16x256xf32>
    %43 = arith.addf %42, %41 : vector<16x256xf32>
    %44 = arith.divf %42, %43 : vector<16x256xf32>
    %45 = math.tanh %37 : vector<16x256xf32>
    %46 = arith.mulf %44, %45 : vector<16x256xf32>
    %47 = arith.truncf %46 : vector<16x256xf32> to vector<16x256xbf16>
    %c0_25 = arith.constant 0 : index
    %c0_26 = arith.constant 0 : index
    %c0_27 = arith.constant 0 : index
    %c0_28 = arith.constant 0 : index
    %48 = vector.load %arg9[%c0_25, %c0_26, %c0_27, %c0_28] : memref<1x1x16x256xbf16, #tpu.memory_space<vmem>>, vector<1x1x16x256xbf16>
    %49 = vector.shape_cast %48 : vector<1x1x16x256xbf16> to vector<16x256xbf16>
    %50 = vector.shape_cast %47 : vector<16x256xbf16> to vector<1x1x16x256xbf16>
    tpu.vector_store %arg9[%c0_25, %c0_26, %c0_27, %c0_28], %50 {strides = array<i32>} : memref<1x1x16x256xbf16, #tpu.memory_space<vmem>>, vector<1x1x16x256xbf16>,
    %51 = arith.truncf %46 : vector<16x256xf32> to vector<16x256xbf16>
    %c0_29 = arith.constant 0 : index
    %c0_30 = arith.constant 0 : index
    %c0_31 = arith.constant 0 : index
    %c0_32 = arith.constant 0 : index
    %52 = vector.load %arg10[%c0_29, %c0_30, %c0_31, %c0_32] : memref<1x1x16x16xf32, #tpu.memory_space<vmem>>, vector<1x1x16x16xf32>
    %53 = vector.shape_cast %52 : vector<1x1x16x16xf32> to vector<16x16xf32>
    %cst_33 = arith.constant dense<0.000000e+00> : vector<16x16xf32>
    %54 = tpu.matmul %51, %51, %cst_33 {dimension_numbers = #tpu.dot_dimension_numbers<[1], [1], [0], [0], [0, 0, 1, 0], [], []>} : vector<16x256xbf16>, vector<16x256xbf16>, vector<16x16xf32> -> vector<16x16xf32>
    %55 = arith.addf %53, %54 : vector<16x16xf32>
    %c0_34 = arith.constant 0 : index
    %c0_35 = arith.constant 0 : index
    %c0_36 = arith.constant 0 : index
    %c0_37 = arith.constant 0 : index
    %56 = vector.load %arg10[%c0_34, %c0_35, %c0_36, %c0_37] : memref<1x1x16x16xf32, #tpu.memory_space<vmem>>, vector<1x1x16x16xf32>
    %57 = vector.shape_cast %56 : vector<1x1x16x16xf32> to vector<16x16xf32>
    %58 = vector.shape_cast %55 : vector<16x16xf32> to vector<1x1x16x16xf32>
    tpu.vector_store %arg10[%c0_34, %c0_35, %c0_36, %c0_37], %58 {strides = array<i32>} : memref<1x1x16x16xf32, #tpu.memory_space<vmem>>, vector<1x1x16x16xf32>,
    return
  }
  func.func @transform_0(%arg0: i32, %arg1: i32, %arg2: i32, %arg3: i32) -> (i32, i32, i32, i32) {
    %c1_i32 = arith.constant 1 : i32
    %0 = arith.muli %arg1, %c1_i32 : i32
    %1 = arith.addi %0, %arg2 : i32
    %c0_i32 = arith.constant 0 : i32
    %c0_i32_0 = arith.constant 0 : i32
    return %1, %arg0, %c0_i32, %arg3 : i32, i32, i32, i32
  }
  func.func @transform_1(%arg0: i32, %arg1: i32, %arg2: i32, %arg3: i32) -> (i32, i32, i32, i32) {
    %c1_i32 = arith.constant 1 : i32
    %0 = arith.muli %arg1, %c1_i32 : i32
    %1 = arith.addi %0, %arg2 : i32
    %c0_i32 = arith.constant 0 : i32
    %c0_i32_0 = arith.constant 0 : i32
    %c0_i32_1 = arith.constant 0 : i32
    return %arg0, %1, %c0_i32, %c0_i32_0 : i32, i32, i32, i32
  }
  func.func @transform_2(%arg0: i32, %arg1: i32, %arg2: i32, %arg3: i32) -> (i32, i32, i32) {
    %c0_i32 = arith.constant 0 : i32
    %c0_i32_0 = arith.constant 0 : i32
    %c0_i32_1 = arith.constant 0 : i32
    return %arg0, %c0_i32, %c0_i32_0 : i32, i32, i32
  }
  func.func @transform_3(%arg0: i32, %arg1: i32, %arg2: i32, %arg3: i32) -> (i32, i32, i32) {
    %c0_i32 = arith.constant 0 : i32
    %c0_i32_0 = arith.constant 0 : i32
    %c0_i32_1 = arith.constant 0 : i32
    return %arg0, %c0_i32, %c0_i32_0 : i32, i32, i32
  }
  func.func @transform_4(%arg0: i32, %arg1: i32, %arg2: i32, %arg3: i32) -> (i32, i32, i32) {
    %c0_i32 = arith.constant 0 : i32
    %c0_i32_0 = arith.constant 0 : i32
    %c0_i32_1 = arith.constant 0 : i32
    return %arg0, %c0_i32, %c0_i32_0 : i32, i32, i32
  }
  func.func @transform_5(%arg0: i32, %arg1: i32, %arg2: i32, %arg3: i32) -> (i32, i32, i32, i32) {
    %c1_i32 = arith.constant 1 : i32
    %0 = arith.muli %arg1, %c1_i32 : i32
    %1 = arith.addi %0, %arg2 : i32
    %c0_i32 = arith.constant 0 : i32
    %c0_i32_0 = arith.constant 0 : i32
    return %1, %arg0, %c0_i32, %arg3 : i32, i32, i32, i32
  }
  func.func @transform_6(%arg0: i32, %arg1: i32, %arg2: i32, %arg3: i32) -> (i32, i32, i32, i32) {
    %c0_i32 = arith.constant 0 : i32
    %c0_i32_0 = arith.constant 0 : i32
    %c0_i32_1 = arith.constant 0 : i32
    return %arg0, %arg1, %c0_i32, %c0_i32_0 : i32, i32, i32, i32
  }
}

</mosaic_0001>

<bundles_post_ra>
// kernel: tpu_custom_call.1
= control target key start
LH: loop header
LB: loop body
LE: loop exit
PB: predicated region body
PF: predicated region fallthrough
CT: control target
= control target key end

     0   :  { %12 = vsyncpa [#allocation3], 0  ;;  %s1539_s0 = inlined_call_operand.vmem [shape: f32[2,2,4,256], index: 0, kind: input, shape index: {}]   ;;  %s1540_s1 = inlined_call_operand.vmem [shape: f32[2,2,32,1], index: 1, kind: input, shape index: {}]   ;;  %s1541_s2 = inlined_call_operand.vmem [shape: bf16[2,16,4], index: 2, kind: input, shape index: {}]   ;;  %s1542_s3 = inlined_call_operand.vmem [shape: f32[2,16,1], index: 3, kind: input, shape index: {}]   ;;  %s1543_s4 = inlined_call_operand.vmem [shape: bf16[2,32,16], index: 4, kind: input, shape index: {}]   ;;  %s1544_s5 = inlined_call_operand.hbm [shape: bf16[2,2,16,256], index: 5, kind: output, shape index: {0}]   ;;  %s1545_s6 = inlined_call_operand.hbm [shape: f32[2,2,16,16], index: 6, kind: output, shape index: {1}]  }
   0x1   :  { %14 = vsyncpa [#allocation3 + $0x1], 0 }
   0x2   :  { %15 = vsyncpa [#allocation5], 0 }
   0x3   :  { %17 = vsyncpa [#allocation5 + $0x1], 0  ;;  %s1318_s21 = smov 0   ;;  %s1320_s22 = smov 0  }
   0x4   :  { %s1322_s23 = smov 0   ;;  %s1324_s24 = smov 0  }
   0x5   :  { %s1326_s25 = smov 0   ;;  %s1328_s26 = smov 0  }
   0x6   :  { %s1330_s27 = smov 0   ;;  %s1332_s28 = smov 0  }
   0x7 LB: > { %1553 = sst [smem:[#allocation8_spill]] %s1247_s21  ;;  %s988_s29 = sadd.s32 4294967295, %s1275_s28   ;;  %s1275_s28 = sphi %s1332_s28, %s23_s28   ;;  %s1271_s27 = sphi %s1330_s27, %s1570_s27   ;;  %s1267_s26 = sphi %s1328_s26, %s1569_s26   ;;  %s1263_s25 = sphi %s1326_s25, %s1568_s25   ;;  %s1259_s24 = sphi %s1324_s24, %s1567_s24   ;;  %s1255_s23 = sphi %s1322_s23, %s1566_s23   ;;  %s1251_s22 = sphi %s1320_s22, %s1572_s22   ;;  %s1247_s21 = sphi %s1318_s21, %s1571_s21  }
   0x8   : > { %1554 = sst [smem:[#allocation9_spill]] %s1255_s23  ;;  %s989_s30 = sadd.s32 4294967294, %s1275_s28  }
   0x9   : > { %1555 = sst [smem:[#allocation10_spill]] %s1267_s26  ;;  %s45_s7 = sadd.s32 1, %s1267_s26 }
   0xa   : > { %1556 = sst [smem:[#allocation11_spill]] %s1271_s27  ;;  %p47_p0 = scmp.ge.s32.totalorder %s45_s7, 2 }
   0xb   : > { %s49_s8 = sadd.s32 1, %s1271_s27  ;;  %p212_p1 = scmp.ne.s32.totalorder %s1255_s23, %s1251_s22 }
   0xc   : > { %p213_p2 = scmp.eq.s32.totalorder %s988_s29, 3  ;;  %s1574_s7 = smov (%p47_p0, %s45_s7), 0 }
   0xd   : > { %1557 = sst [smem:[#allocation12_spill]] %s1574_s7  ;;  %s1576_s8 = smov (!%p47_p0, %s49_s8), %s1271_s27 }
   0xe   : > { %s195_s9 = ssub.s32 %s1267_s26, %s1574_s7  ;;  %p1369_p3 = por %p213_p2, %p212_p1 }
   0xf   : > { %p51_p4 = scmp.ge.s32.totalorder %s1576_s8, 2  ;;  %p218_p5 = scmp.ne.s32.totalorder %s1251_s22, %s1247_s21 }
  0x10   : > { %p219_p6 = scmp.eq.s32.totalorder %s989_s30, 3  ;;  %p992_p7 = scmp.ge.s32.totalorder %s1275_s28, 1 }
  0x11   : > { %s1578_s8 = smov (%p51_p4, %s1576_s8), 0  ;;  %p322_p9 = scmp.lt.s32.totalorder %s1275_s28, 5 }
  0x12   : > { %1559 = sst [smem:[#allocation13_spill]] %s1578_s8  ;;  %p1378_p8 = por %p219_p6, %p218_p5 }
  0x13   : > { %s196_s12 = ssub.s32 %s1271_s27, %s1578_s8  ;;  %s202_s13 = sadd.s32 1, %s1255_s23 }
  0x14   : > { %s1560_s11 = scalar_select %p1378_p8, 1, 0 }
  0x15   : > { %s197_s14 = sor.u32 %s196_s12, %s195_s9  ;;  %p323_p10 = pnand %p992_p7, %p322_p9 }
  0x16   : > { %1561 = sst [smem:[#allocation14_spill]] %s1560_s11  ;;  %p200_p11 = scmp.eq.s32.totalorder %s197_s14, 0 }
  0x17   : > { %326 = sbr.rel (%p323_p10) target bundleno = 740 (0x2e4), region = 40  ;;  %p393_p12 = scmp.lt.s32.totalorder (!%p323_p10), %s1259_s24, 1 }
  0x18   : > { %s1387_s15 = scalar_select %p200_p11, %s1255_s23, %s202_s13  }
  0x19   : > { %p395_p13 = scmp.lt.s32.totalorder (!%p323_p10), %s1263_s25, 1  ;;  %s1420_s21 = sand.u32 (!%p323_p10), 1, %s1251_s22  }
  0x1a   : > { %1562 = sst [smem:[#allocation15_spill]] %s1387_s15  ;;  %s993_s23 = sshll.u32 (!%p323_p10), %s1420_s21, 4 }
  0x1b   : > { %s383_s11 = scalar_lea.vmem (!%p323_p10), [#allocation2], %s993_s23  ;;  %s1022_s15 = sshll.u32 (!%p323_p10), %s1263_s25, 2 }
  0x1c   : > { %v1277_v0 = vmov 0   ;;  %s394_s16 = scalar_select %p393_p12, %s1259_s24, 1  ;;  %vm474_vm0 = vcmask 1041408   ;;  %vm470_vm1 = vcmask 31744   ;;  %vm442_vm2 = vcmask 130048  }
  0x1d   : > { %513 = vmatprep.mubr.bf16.mxu0 %v1277_v0  ;;  %1115 = vset.pattern.permute.xlu0 %v1277_v0  ;;  %s396_s17 = scalar_select %p395_p13, %s1263_s25, 1  ;;  %v1278_v63 = vmov 0.0  }
  0x1e   : > { %639 = vmatprep.mubr.bf16.mxu1 %v1277_v0  ;;  %1116 = vset.pattern.permute.xlu1 %v1277_v0  ;;  %s996_s18 = sshll.u32 %s394_s16, 2  ;;  %s781_s13 = sshll.u32 %s383_s11, 4  ;;  %s1442_s13 = int_to_ptr.vmem [resolvable:$true] %s781_s13 }
  0x1f   : > { %s995_s19 = sshll.u32 %s396_s17, 1  ;;  %s999_s20 = sshll.u32 %s396_s17, 3 }
  0x20   : > { %s402_s29 = sadd.s32 %s996_s18, %s995_s19  ;;  %s414_s30 = sadd.s32 %s999_s20, %s996_s18 }
  0x21   : > { %s997_s9 = sshll.u32 %s402_s29, 2  ;;  %s422_s14 = scalar_lea.vmem %s1541_s2, %s999_s20 }
  0x22   : > { %s404_s27 = scalar_lea.vmem %s1539_s0, %s997_s9  ;;  %s1031_s26 = sshll.u32 %s396_s17, 4  ;;  %v1118_v8 = vld [vmem:[%s422_s14] sm:$0xff]  }
  0x23   : > { %v445_v1 = vld [vmem:[%s404_s27] sm:$0xff]  ;;  %s427_s16 = scalar_lea.vmem %s1542_s3, %s1031_s26  ;;  %s1409_s18 = scalar_lea.vmem %s1543_s4, %s1031_s26 }
  0x24   : > { %v447_v2 = vcombine.high %v445_v1, %v445_v1  ;;  %v449_v3 = vpack.c.bf16 %v445_v1, %v445_v1  ;;  %v453_v4 = vld [vmem:[%s427_s16] sm:$0xff]  ;;  %s1000_s19 = sshll.u32 %s414_s30, 3  ;;  %v454_v7 = vld [vmem:[%s427_s16 + $0x8] sm:$0xff]  ;;  %s1425_s26 = scalar_lea.vmem [#allocation4], %s993_s23 }
  0x25   : > { %457 = vperm.xlu0 %1115, %v453_v4   ;;  %s416_s8 = scalar_lea.vmem %s1540_s1, %s1000_s19  ;;  %v1119_v61 = vld [vmem:[%s1409_s18] sm:$0xff]   ;;  %v1120_v62 = vld [vmem:[%s1409_s18 + $0x8] sm:$0xff]   ;;  %443 = vst.msk [vmem:[%s1425_s26] sm:$0xff] %vm442_vm2, %v1278_v63  ;;  %444 = vst.msk [vmem:[%s1425_s26 + $0x8] sm:$0xff] %vm442_vm2, %v1278_v63  ;;  %s1023_s17 = sshll.u32 %s1259_s24, 3 }
  0x26   : > { %v450_v5 = vpack.c.bf16 %v447_v2, %v447_v2  ;;  %v476_v6 = vsel %vm474_vm0, %v449_v3, 0  ;;  %v568_v9 = vld [vmem:[%s416_s8 + $0x10] sm:$0xff]  ;;  %v566_v10 = vld [vmem:[%s416_s8] sm:$0xff]  ;;  %v567_v11 = vld [vmem:[%s416_s8 + $0x8] sm:$0xff]  ;;  %s778_s20 = sadd.s32 %s1023_s17, %s1022_s15  ;;  %s758_s14 = scalar_lea.sflag [#allocation3], %s1420_s21 }
  0x27   : > { %572 = vperm.xlu1 %1116, %v566_v10   ;;  %v569_v12 = vld [vmem:[%s416_s8 + $0x18] sm:$0xff]  ;;  %s1024_s29 = sshll.u32 %s778_s20, 6  ;;  %s1153_s16 = scalar_lea.vmem %s1442_s13, 256 }
  0x28   : > { %1008 = vmatprep.subr.msk.bf16.mxu0 %vm474_vm0, %v450_v5  ;;  %s1440_s12 = scalar_lea.hbm %s1544_s5, %s1024_s29  ;;  %p1154_p0 = scmp.ne.s32.totalorder %s1442_s13, %s1153_s16 }
  0x29   : > { %496 = vmatpush1.bf16.msra.mxu0 %v476_v6  ;;  %462 = vperm.xlu0 %1115, %v454_v7   ;;  %s1279_s18 = smov [#allocation2]  }
  0x2a   : > { %p1155_p1 = pnand %p1154_p0, %p1369_p3  ;;  %s1157_s19 = sshll.u32 %s1279_s18, 4  ;;  %s1158_s19 = int_to_ptr.vmem [resolvable:$false] %s1157_s19 }
  0x2b   : > { %577 = vperm.xlu1 %1116, %v567_v11   ;;  %s1159_s7 = scalar_lea.vmem %s1158_s19, 512  ;;  %p1160_p4 = scmp.lt.s32.totalorder %s1442_s13, %s1158_s19 }
  0x2c   : > { %1009 = vmatmul.mubr.msk.bf16.vlgmr.msra.gmra.mxu0 %vm470_vm1, %v1118_v8  ;;  %p1156_p2 = pneg %p1155_p1  ;;  %p1161_p5 = scmp.lt.s32.totalorder %s1159_s7, %s1153_s16 }
  0x2d   : > { %582 = vperm.xlu0 %1115, %v568_v9  }
  0x2e   : > { %p1162_p6 = por %p1161_p5, %p1160_p4 }
  0x2f   : > { %587 = vperm.xlu1 %1116, %v569_v12  }
  0x30   : > { %p1163_p7 = pnand %p1162_p6, %p1156_p2 }
  0xa0   : > { %v458_v13 = vpop.permute.xlu0 %457 }
  0xa2   : > { %v573_v1 = vpop.permute.xlu1 %572 }
  0xa4   : > { %v463_v19 = vpop.permute.xlu0 %462 }
  0xa6   : > { %v578_v6 = vpop.permute.xlu1 %577 }
  0xec   : > { %v515_v14 = vpop.f32.mrf.mxu0 }
  0xed   : > { %v516_v15 = vadd.f32 %v515_v14, %v458_v13 }
  0xee   : > { %v517_v16 = vpop.f32.mrf.mxu0 }
  0xef   : > { %v524_v17 = vmul.f32 %v516_v15, %v516_v15  ;;  %v518_v18 = vadd.f32 %v517_v16, %v458_v13 }
  0xf0   : > { %v519_v20 = vpop.f32.mrf.mxu0 }
  0xf1   : > { %v528_v21 = vmul.f32 %v524_v17, %v516_v15  ;;  %v525_v22 = vmul.f32 %v518_v18, %v518_v18  ;;  %v520_v23 = vadd.f32 %v519_v20, %v463_v19  ;;  %v583_v20 = vpop.permute.xlu0 %582 }
  0xf2   : > { %v521_v24 = vpop.f32.mrf.mxu0 }
  0xf3   : > { %v532_v25 = vmul.f32 0.044715, %v528_v21  ;;  %v529_v26 = vmul.f32 %v525_v22, %v518_v18  ;;  %v526_v27 = vmul.f32 %v520_v23, %v520_v23  ;;  %v522_v28 = vadd.f32 %v521_v24, %v463_v19 }
  0xf5   : > { %v536_v29 = vadd.f32 %v532_v25, %v516_v15  ;;  %v533_v30 = vmul.f32 0.044715, %v529_v26  ;;  %v530_v31 = vmul.f32 %v526_v27, %v520_v23  ;;  %v527_v32 = vmul.f32 %v522_v28, %v522_v28  ;;  %v588_v26 = vpop.permute.xlu1 %587 }
  0xf7   : > { %v540_v33 = vmul.f32 0.7978846, %v536_v29  ;;  %v537_v34 = vadd.f32 %v533_v30, %v518_v18  ;;  %v534_v35 = vmul.f32 0.044715, %v530_v31  ;;  %v531_v36 = vmul.f32 %v527_v32, %v522_v28 }
  0xf9   : > { %v538_v37 = vadd.f32 %v534_v35, %v520_v23  ;;  %v535_v38 = vmul.f32 0.044715, %v531_v36  ;;  %v541_v39 = vmul.f32 0.7978846, %v537_v34  ;;  %1121 = vtanh.f32 %v540_v33 }
  0xfb   : > { %v542_v40 = vmul.f32 0.7978846, %v538_v37  ;;  %v539_v41 = vadd.f32 %v535_v38, %v522_v28  ;;  %1123 = vtanh.f32 %v541_v39 }
  0xfd   : > { %v543_v42 = vmul.f32 0.7978846, %v539_v41  ;;  %1125 = vtanh.f32 %v542_v40 }
  0xff   : > { %1127 = vtanh.f32 %v543_v42 }
 0x106   : > { %v1122_v43 = vpop.eup %1121 }
 0x107   : > { %v548_v47 = vadd.f32 1.0, %v1122_v43 }
 0x108   : > { %v1124_v44 = vpop.eup %1123 }
 0x109   : > { %v549_v45 = vadd.f32 1.0, %v1124_v44  ;;  %v552_v53 = vmul.f32 0.5, %v548_v47 }
 0x10a   : > { %v1126_v46 = vpop.eup %1125 }
 0x10b   : > { %v550_v48 = vadd.f32 1.0, %v1126_v46  ;;  %v553_v51 = vmul.f32 0.5, %v549_v45  ;;  %v556_v58 = vmul.f32 %v552_v53, %v516_v15 }
 0x10c   : > { %v1128_v49 = vpop.eup %1127 }
 0x10d   : > { %v551_v50 = vadd.f32 1.0, %v1128_v49  ;;  %v554_v52 = vmul.f32 0.5, %v550_v48  ;;  %v557_v56 = vmul.f32 %v553_v51, %v518_v18 }
 0x10f   : > { %v555_v54 = vmul.f32 0.5, %v551_v50  ;;  %v558_v55 = vmul.f32 %v554_v52, %v520_v23 }
 0x111   : > { %v559_v57 = vmul.f32 %v555_v54, %v522_v28  ;;  %v564_v60 = vpack.c.bf16 %v558_v55, %v556_v58 }
 0x113   : > { %v565_v59 = vpack.c.bf16 %v559_v57, %v557_v56 }
 0x115   : > { %621 = vmatprep.subr.bf16.mxu1 %v565_v59 }
 0x116   : > { %622 = vmatpush1.bf16.msra.mxu1 %v564_v60 }
 0x119   : > { %1012 = vmatmul.mubr.msk.bf16.vlgmr.msra.gmra.mxu1 %vm442_vm2, %v1119_v61 }
 0x11a   : > { %649 = vmatprep.mubr.bf16.mxu1 %v1277_v0 }
 0x121   : > { %1013 = vmatmul.mubr.msk.bf16.gmra.mxu1 %vm442_vm2, %v1120_v62 }
 0x1d9   : > { %v641_v0 = vpop.f32.mrf.mxu1 }
 0x1da   : > { %v642_v2 = vadd.f32 %v641_v0, %v573_v1 }
 0x1db   : > { %v643_v3 = vpop.f32.mrf.mxu1 }
 0x1dc   : > { %v660_v4 = vsub.f32 0.0, %v642_v2  ;;  %v644_v5 = vadd.f32 %v643_v3, %v573_v1 }
 0x1dd   : > { %v645_v7 = vpop.f32.mrf.mxu1 }
 0x1de   : > { %v1014_v8 = vmul.f32 -1.442695, %v660_v4  ;;  %v661_v9 = vsub.f32 0.0, %v644_v5  ;;  %v646_v10 = vadd.f32 %v645_v7, %v578_v6 }
 0x1df   : > { %v647_v11 = vpop.f32.mrf.mxu1 }
 0x1e0   : > { %1129 = vpow2.f32 %v1014_v8  ;;  %v1015_v12 = vmul.f32 -1.442695, %v661_v9  ;;  %v662_v13 = vsub.f32 0.0, %v646_v10  ;;  %v648_v14 = vadd.f32 %v647_v11, %v578_v6 }
 0x1e1   : > { %v651_v17 = vpop.f32.mrf.mxu1 }
 0x1e2   : > { %1131 = vpow2.f32 %v1015_v12  ;;  %v1016_v15 = vmul.f32 -1.442695, %v662_v13  ;;  %v663_v16 = vsub.f32 0.0, %v648_v14  ;;  %v652_v22 = vadd.f32 %v651_v17, %v583_v20 }
 0x1e3   : > { %v653_v19 = vpop.f32.mrf.mxu1 }
 0x1e4   : > { %1133 = vpow2.f32 %v1016_v15  ;;  %v1017_v18 = vmul.f32 -1.442695, %v663_v16  ;;  %v654_v24 = vadd.f32 %v653_v19, %v583_v20 }
 0x1e5   : > { %v655_v21 = vpop.f32.mrf.mxu1 }
 0x1e6   : > { %1135 = vpow2.f32 %v1017_v18  ;;  %v656_v29 = vadd.f32 %v655_v21, %v588_v26 }
 0x1e7   : > { %v657_v27 = vpop.f32.mrf.mxu1  ;;  %1137 = vtanh.f32 %v652_v22 }
 0x1e8   : > { %v658_v32 = vadd.f32 %v657_v27, %v588_v26 }
 0x1ed   : > { %v1130_v23 = vpop.eup %1129 }
 0x1ee   : > { %v676_v25 = vadd.f32 1.0, %v1130_v23 }
 0x1ef   : > { %v1132_v28 = vpop.eup %1131 }
 0x1f0   : > { %1139 = vrcp.f32 %v676_v25  ;;  %v677_v30 = vadd.f32 1.0, %v1132_v28 }
 0x1f1   : > { %v1134_v31 = vpop.eup %1133  ;;  %1141 = vtanh.f32 %v654_v24 }
 0x1f2   : > { %1143 = vrcp.f32 %v677_v30  ;;  %v678_v33 = vadd.f32 1.0, %v1134_v31 }
 0x1f3   : > { %v1136_v34 = vpop.eup %1135  ;;  %1145 = vtanh.f32 %v656_v29 }
 0x1f4   : > { %1147 = vrcp.f32 %v678_v33  ;;  %v679_v35 = vadd.f32 1.0, %v1136_v34  ;;  %v1138_v36 = vpop.eup %1137 }
 0x1f5   : > { %1149 = vtanh.f32 %v658_v32 }
 0x1f6   : > { %1151 = vrcp.f32 %v679_v35 }
 0x1fd   : > { %v1140_v37 = vpop.eup %1139 }
 0x1fe   : > { %v1142_v38 = vpop.eup %1141  ;;  %v692_v41 = vmul.f32 %v1140_v37, %v1138_v36 }
 0x1ff   : > { %v1144_v39 = vpop.eup %1143 }
 0x200   : > { %v1146_v40 = vpop.eup %1145  ;;  %v693_v42 = vmul.f32 %v1144_v39, %v1142_v38 }
 0x201   : > { %v1148_v43 = vpop.eup %1147 }
 0x202   : > { %v1150_v44 = vpop.eup %1149  ;;  %v1033_v45 = vpack.c.bf16 %v693_v42, %v692_v41  ;;  %v694_v47 = vmul.f32 %v1148_v43, %v1146_v40 }
 0x203   : > { %v1152_v46 = vpop.eup %1151 }
 0x204   : > { %v695_v48 = vmul.f32 %v1152_v46, %v1150_v44  ;;  %708 = vst [vmem:[%s383_s11] sm:$0xff] %v1033_v45  ;;  %v696_v51 = vpack.c.bf16 %v694_v47, %v692_v41 }
 0x206   : > { %v697_v49 = vpack.c.bf16 %v695_v48, %v693_v42  ;;  %v1034_v50 = vpack.c.bf16 %v695_v48, %v694_v47 }
 0x208   : > { %709 = vst [vmem:[%s383_s11 + $0x8] sm:$0xff] %v1034_v50  ;;  %726 = vmatprep.subr.bf16.mxu0 %v697_v49  ;;  %744 = vmatprep.mubr.bf16.mxu0 %v697_v49 }
 0x209   : > { %727 = vmatpush1.bf16.xpose.msra.mxu0 %v696_v51 }
 0x210   : > { %745 = vmatmul.mubr.bf16.vlgmr.msra.gmra.mxu0 %v696_v51 }
 0x211   : > { %1166 = shalt.err (!%p1163_p7)
}
 0x212   : > { %s1167_s27 = scalar_lea.hbm %s1440_s12, 256  ;;  %s1171_s11 = scalar_lea.hbm %s1544_s5, 1024 }
 0x213   : > { %p1168_p9 = scmp.ne.s32.totalorder %s1440_s12, %s1167_s27  ;;  %p1172_p12 = scmp.lt.s32.totalorder %s1440_s12, %s1544_s5 }
 0x214   : > { %p1173_p13 = scmp.lt.s32.totalorder %s1171_s11, %s1167_s27 }
 0x215   : > { %p1169_p10 = pnand %p1168_p9, %p1369_p3 }
 0x216   : > { %p1174_p0 = por %p1173_p13, %p1172_p12 }
 0x217   : > { %p1170_p11 = pneg %p1169_p10 }
 0x219   : > { %p1175_p1 = pnand %p1174_p0, %p1170_p11 }
 0x21b   : > { %1178 = shalt.err (!%p1175_p1)
}
 0x21c   : > { %s1280_s29 = smov 128   ;;  %s1281_s30 = smov 8   ;;  %v710_v52 = vld [vmem:[%s1425_s26] sm:$0xff]  ;;  %v711_v56 = vld [vmem:[%s1425_s26 + $0x8] sm:$0xff] }
 0x21d   : > { %1035 = dma.vmem_to_hbm [thread:$0]  (%p1369_p3), %s1442_s13, 256, %s1440_s12, %s758_s14, %s1280_s29, %s1280_s29, %s1281_s30  }
 0x21e   : > { %s1025_s9 = sshll.u32 %s1259_s24, 1  ;;  %s799_s19 = sshll.u32 %s1425_s26, 4  ;;  %s1483_s19 = int_to_ptr.vmem [resolvable:$true] %s799_s19 }
 0x21f   : > { %s796_s16 = sadd.s32 %s1025_s9, %s1022_s15  ;;  %s763_s24 = scalar_lea.sflag [#allocation5], %s1420_s21 }
 0x220   : > { %s1027_s18 = sshll.u32 %s796_s16, 7  ;;  %s1179_s25 = scalar_lea.vmem %s1483_s19, 256 }
 0x221   : > { %s1481_s12 = scalar_lea.hbm %s1545_s6, %s1027_s18  ;;  %p1180_p2 = scmp.ne.s32.totalorder %s1483_s19, %s1179_s25 }
 0x222   : > { %s1282_s15 = smov [#allocation4]  }
 0x223   : > { %p1181_p4 = pnand %p1180_p2, %p1369_p3  ;;  %s1183_s13 = sshll.u32 %s1282_s15, 4  ;;  %s1184_s13 = int_to_ptr.vmem [resolvable:$false] %s1183_s13 }
 0x224   : > { %s1185_s14 = scalar_lea.vmem %s1184_s13, 512  ;;  %p1186_p6 = scmp.lt.s32.totalorder %s1483_s19, %s1184_s13 }
 0x225   : > { %p1182_p5 = pneg %p1181_p4  ;;  %p1187_p7 = scmp.lt.s32.totalorder %s1185_s14, %s1179_s25 }
 0x227   : > { %p1188_p9 = por %p1187_p7, %p1186_p6 }
 0x229   : > { %p1189_p10 = pnand %p1188_p9, %p1182_p5 }
 0x2d0   : > { %v746_v53 = vpop.f32.mrf.mxu0 }
 0x2d1   : > { %v753_v54 = vadd.f32 %v746_v53, %v710_v52 }
 0x2d2   : > { %v748_v55 = vpop.f32.mrf.mxu0 }
 0x2d3   : > { %755 = vst.msk [vmem:[%s1425_s26] sm:$0xff] %vm442_vm2, %v753_v54 }
 0x2d4   : > { %v749_v57 = vpop.f32.mrf.mxu0 }
 0x2d5   : > { %v754_v58 = vadd.f32 %v749_v57, %v711_v56 }
 0x2d6   : > { %v751_v59 = vpop.f32.mrf.mxu0 }
 0x2d7   : > { %756 = vst.msk [vmem:[%s1425_s26 + $0x8] sm:$0xff] %vm442_vm2, %v754_v58 }
 0x2d8   : > { %1192 = shalt.err (!%p1189_p10)
}
 0x2d9   : > { %s1193_s26 = scalar_lea.hbm %s1481_s12, 256  ;;  %s1197_s23 = scalar_lea.hbm %s1545_s6, 1024 }
 0x2da   : > { %p1194_p11 = scmp.ne.s32.totalorder %s1481_s12, %s1193_s26  ;;  %p1198_p0 = scmp.lt.s32.totalorder %s1481_s12, %s1545_s6 }
 0x2db   : > { %p1199_p1 = scmp.lt.s32.totalorder %s1197_s23, %s1193_s26 }
 0x2dc   : > { %p1195_p12 = pnand %p1194_p11, %p1369_p3 }
 0x2dd   : > { %p1200_p2 = por %p1199_p1, %p1198_p0 }
 0x2de   : > { %p1196_p13 = pneg %p1195_p12 }
 0x2e0   : > { %p1201_p4 = pnand %p1200_p2, %p1196_p13 }
 0x2e2   : > { %1204 = shalt.err (!%p1201_p4)
}
 0x2e3   : > { %1036 = dma.vmem_to_hbm [thread:$0]  (%p1369_p3), %s1483_s19, 256, %s1481_s12, %s763_s24, %s1280_s29, %s1280_s29, %s1281_s30  }
 0x2e4 PF: > { %s1563_s20 = sld [smem:[#allocation8_spill]]  ;;  %p1046_p5 = scmp.ge.s32.totalorder %s1275_s28, 2 }
 0x2e6   : > { %p1040_p6 = pnand %p1046_p5, %p1378_p8 }
 0x2e8   : > { %p1041_p7 = pneg %p1040_p6 }
 0x2ea   : > { %s814_s16 = sand.u32 1, %s1563_s20  }
 0x2eb   : > { %s815_s18 = scalar_lea.sflag [#allocation3], %s814_s16 }
 0x2ec   : > { %1238 = dma.done.wait (%p1041_p7), %s815_s18, 256  }
 0x2ed   : > { %1240 = vsyncadd (%p1041_p7), %s815_s18, 4294967040  ;;  %s824_s7 = scalar_lea.sflag [#allocation5], %s814_s16 }
 0x2ee   : > { %1242 = dma.done.wait (%p1041_p7), %s824_s7, 256  }
 0x2ef   : > { %1244 = vsyncadd (%p1041_p7), %s824_s7, 4294967040  ;;  %s23_s28 = sadd.s32 1, %s1275_s28   ;;  %s1565_s10 = sld [smem:[#allocation9_spill]] }
 0x2f0   : > { %p20_p9 = scmp.ge.s32.totalorder %s23_s28, 6   ;;  %s1566_s23 = sld [smem:[#allocation15_spill]] }
 0x2f1   : > { %s1567_s24 = sld [smem:[#allocation10_spill]]  ;;  %s1571_s21 = smov %s1251_s22 }
 0x2f2   : > { %s1568_s25 = sld [smem:[#allocation11_spill]]  ;;  %22 = sbr.rel (!%p20_p9) target bundleno = 7 (0x7), region = 108 }
 0x2f3   : > { %s1569_s26 = sld [smem:[#allocation12_spill]] }
 0x2f4   : > { %s1570_s27 = sld [smem:[#allocation13_spill]] }
 0x2f5   : > { %s1572_s22 = smov %s1565_s10 }
 0x2f7   :  { %829 = vsyncpa [#allocation3], 1 }
 0x2f8   :  { %831 = vsyncpa [#allocation3 + $0x1], 1 }
 0x2f9   :  { %832 = vsyncpa [#allocation5], 1 }
 0x2fa   :  { %834 = vsyncpa [#allocation5 + $0x1], 1 }

</bundles_post_ra>
